<compile_context>
chip_gen: v5e
topology: v5e:2x2
jax: 0.10.0
libtpu: 0.0.40
codegen_flags: <defaults>
</compile_context>

<pallas_src>
import numpy as np
import jax
import jax.numpy as jnp
from jax.experimental import pallas as pl
from jax.experimental.pallas import tpu as pltpu

BN_EPS = 1e-5
_VMEM_LIMIT_BYTES = 32 * 1024 * 1024   # explicit scoped-VMEM budget (fits v5e/v6e/v7x)


def make_gated_deconv_bn1d(in_channels, out_channels, kernel_size,
                           stride=1, padding=0, output_padding=0, dilation=1,
                           compute_dtype=jnp.bfloat16):
    c_in = in_channels
    c_out = out_channels
    c2 = 2 * out_channels
    k = kernel_size
    d = dilation
    kc = k * c_in

    def _im2col(x):
        # x: (C_in, L_up) -> (K*C_in, L_out); K lane-shifted views stacked along sublanes.
        l_out = x.shape[-1] - d * (k - 1)
        return jnp.concatenate([x[:, kk * d: kk * d + l_out] for kk in range(k)], axis=0)

    def _stats_kernel(xup_ref, w_ref, stat_ref):
        # One batch element per grid step: deconv tile + single-sweep sum / sum-of-squares.
        x_col = _im2col(xup_ref[0])                                          # (K*C_in, L_out) bf16
        y = jnp.dot(w_ref[...], x_col, preferred_element_type=jnp.float32)   # (2*C_out, L_out) f32
        stat_ref[0] = jnp.concatenate(
            [jnp.sum(y, axis=1, keepdims=True),
             jnp.sum(y * y, axis=1, keepdims=True)], axis=1)                 # (2*C_out, 2)

    def _apply_kernel(xup_ref, w_ref, scale_ref, shift_ref, out_ref):
        # Recompute the deconv tile, apply folded BN as a single per-channel FMA, then GLU;
        # store lane-dense (C_out, L_out) directly in the PyTorch NCL layout.
        x_col = _im2col(xup_ref[0])
        y = jnp.dot(w_ref[...], x_col, preferred_element_type=jnp.float32)   # (2*C_out, L_out)
        y = y * scale_ref[...] + shift_ref[...]                              # folded BN (one FMA)
        a = y[:c_out, :]
        g = y[c_out:, :]
        out_ref[0] = a * jax.nn.sigmoid(g)

    def forward(x_ncl, weight, bias, gamma, beta):
        """x_ncl: (N, C_in, L). weight: (C_in, 2*C_out, K) (ConvTranspose1d layout).
        `bias` is accepted for API parity but unused: train-mode BN cancels it exactly.
        Returns (N, C_out, L_out) in the PyTorch layout (no wrapper transpose needed)."""
        del bias  # cancelled exactly by the batch-mean subtraction of train-mode BN
        n, _, l = x_ncl.shape
        l_out = (l - 1) * stride - 2 * padding + d * (k - 1) + output_padding + 1
        pad_left = d * (k - 1) - padding
        pad_right = d * (k - 1) - padding + output_padding
        # documented limitation (same as previous version): crop-style configs unsupported
        assert pad_left >= 0 and pad_right >= 0, \
            "unsupported config: padding > dilation*(kernel_size-1)"

        # zero-stuff (interior padding) + edge pad in one fused lax.pad, streamed as bf16
        x_bf = x_ncl.astype(jnp.float32).astype(compute_dtype)
        x_up = jax.lax.pad(x_bf, jnp.zeros((), compute_dtype),
                           [(0, 0, 0), (0, 0, 0), (pad_left, pad_right, stride - 1)])
        l_up = x_up.shape[2]

        # spatially flipped kernel folded to (2*C_out, K*C_in); column index = kk*C_in + ci
        w_flip = weight.astype(jnp.float32)[:, :, ::-1]                      # (C_in, 2*C_out, K)
        w_mat = jnp.transpose(w_flip, (1, 2, 0)).reshape(c2, kc).astype(compute_dtype)

        grid = (n,)
        cparams = pltpu.CompilerParams(dimension_semantics=("parallel",),
                                       vmem_limit_bytes=_VMEM_LIMIT_BYTES)

        # ---- pass 1: per-batch partial (sum, sum_sq) per channel, single sweep over y ----
        stats = pl.pallas_call(
            _stats_kernel,
            grid=grid,
            out_shape=jax.ShapeDtypeStruct((n, c2, 2), jnp.float32),
            in_specs=[pl.BlockSpec((1, c_in, l_up), lambda i: (i, 0, 0)),
                      pl.BlockSpec((c2, kc), lambda i: (0, 0))],
            out_specs=pl.BlockSpec((1, c2, 2), lambda i: (i, 0, 0)),
            compiler_params=cparams,
        )(x_up, w_mat)

        # ---- fold batch stats + affine into per-channel scale/shift (tiny, plain JAX) ----
        tot = jnp.sum(stats, axis=0)                                         # (2*C_out, 2)
        cnt = jnp.float32(n * l_out)
        mean = tot[:, 0] / cnt
        var = jnp.maximum(tot[:, 1] / cnt - mean * mean, 0.0)                # biased var (train BN)
        scale = gamma.astype(jnp.float32) * jax.lax.rsqrt(var + BN_EPS)
        shift = beta.astype(jnp.float32) - mean * scale

        # ---- pass 2: recompute deconv tile, fused BN FMA + GLU, lane-dense NCL store ----
        out = pl.pallas_call(
            _apply_kernel,
            grid=grid,
            out_shape=jax.ShapeDtypeStruct((n, c_out, l_out), jnp.float32),
            in_specs=[pl.BlockSpec((1, c_in, l_up), lambda i: (i, 0, 0)),
                      pl.BlockSpec((c2, kc), lambda i: (0, 0)),
                      pl.BlockSpec((c2, 1), lambda i: (0, 0)),
                      pl.BlockSpec((c2, 1), lambda i: (0, 0))],
            out_specs=pl.BlockSpec((1, c_out, l_out), lambda i: (i, 0, 0)),
            compiler_params=cparams,
        )(x_up, w_mat, scale.reshape(c2, 1), shift.reshape(c2, 1))
        return out

    return jax.jit(forward)


def _reference_forward(x, w, b, gamma, beta, stride, padding, output_padding, dilation):
    """Pure-numpy float64 reference implementing the PyTorch semantics directly."""
    n, c_in, l = x.shape
    _, c2, k = w.shape
    l_out = (l - 1) * stride - 2 * padding + dilation * (k - 1) + output_padding + 1
    y = np.zeros((n, c2, l_out), np.float64)
    for ni in range(n):
        for li in range(l):
            for kk in range(k):
                lo = li * stride - padding + kk * dilation
                if 0 <= lo < l_out:
                    y[ni, :, lo] += x[ni, :, li] @ w[:, :, kk]
    y += b[None, :, None]
    mean = y.mean(axis=(0, 2), keepdims=True)
    var = y.var(axis=(0, 2), keepdims=True)
    y = (y - mean) / np.sqrt(var + BN_EPS) * gamma[None, :, None] + beta[None, :, None]
    half = c2 // 2
    a, g = y[:, :half], y[:, half:]
    return a * (1.0 / (1.0 + np.exp(-g)))


if __name__ == "__main__":
    # module config
    in_channels, out_channels, kernel_size = 4, 4, 3
    stride, padding, output_padding, dilation = 2, 1, 1, 1
    N, L = 2, 16
    c2 = 2 * out_channels

    key = jax.random.PRNGKey(0)
    kx, kw, kb, kg, kbt = jax.random.split(key, 5)
    x = jax.random.normal(kx, (N, in_channels, L), jnp.float32)
    weight = jax.random.normal(kw, (in_channels, c2, kernel_size), jnp.float32) * 0.2
    bias = jax.random.normal(kb, (c2,), jnp.float32) * 0.1
    gamma = 1.0 + 0.1 * jax.random.normal(kg, (c2,), jnp.float32)
    beta = 0.1 * jax.random.normal(kbt, (c2,), jnp.float32)

    fwd = make_gated_deconv_bn1d(in_channels, out_channels, kernel_size,
                                 stride, padding, output_padding, dilation)
    out = jax.block_until_ready(fwd(x, weight, bias, gamma, beta))

    # Reference: float64 numpy with x / weight pre-quantized to bf16 to mirror the kernel's
    # bf16 input streaming (everything downstream of the matmul is f32 in the kernel, so a
    # tight tolerance still holds).  bias is passed un-dropped to prove the BN cancellation.
    x_q = np.asarray(x.astype(jnp.bfloat16).astype(jnp.float32), np.float64)
    w_q = np.asarray(weight.astype(jnp.bfloat16).astype(jnp.float32), np.float64)
    ref = _reference_forward(x_q, w_q, np.asarray(bias, np.float64),
                             np.asarray(gamma, np.float64), np.asarray(beta, np.float64),
                             stride, padding, output_padding, dilation)
    np.testing.assert_allclose(np.asarray(out), ref, rtol=1e-3, atol=1e-3)
    print("KERNEL_OK")
</pallas_src>

<mosaic_0001>
module attributes {stable_mosaic.version = 11 : i64} {
  func.func @_stats_kernel(%arg0: i32, %arg1: memref<1x4x34xbf16, #tpu.memory_space<vmem>>, %arg2: memref<8x12xbf16, #tpu.memory_space<vmem>>, %arg3: memref<1x8x2xf32, #tpu.memory_space<vmem>>) attributes {dimension_semantics = [#tpu.dimension_semantics<parallel>], iteration_bounds = array<i64: 2>, scalar_prefetch = 0 : i64, scratch_operands = 0 : i64, tpu.core_type = #tpu.core_type<tc>, window_params = [{transform_indices = @transform_0, window_bounds = array<i64: 1, 4, 34>}, {pipeline_mode = #tpu.pipeline_mode<synchronous>, transform_indices = @transform_1, window_bounds = array<i64: 8, 12>}, {transform_indices = @transform_2, window_bounds = array<i64: 1, 8, 2>}]} {
    %c0 = arith.constant 0 : index
    %c0_0 = arith.constant 0 : index
    %c0_1 = arith.constant 0 : index
    %0 = vector.load %arg1[%c0, %c0_0, %c0_1] : memref<1x4x34xbf16, #tpu.memory_space<vmem>>, vector<1x4x34xbf16>
    %1 = vector.shape_cast %0 : vector<1x4x34xbf16> to vector<4x34xbf16>
    %2 = vector.extract_strided_slice %1 {offsets = [0, 0], sizes = [4, 32], strides = [1, 1]} : vector<4x34xbf16> to vector<4x32xbf16>
    %3 = vector.extract_strided_slice %1 {offsets = [0, 1], sizes = [4, 32], strides = [1, 1]} : vector<4x34xbf16> to vector<4x32xbf16>
    %4 = vector.extract_strided_slice %1 {offsets = [0, 2], sizes = [4, 32], strides = [1, 1]} : vector<4x34xbf16> to vector<4x32xbf16>
    %5 = tpu.concatenate %2, %3, %4 in 0 : vector<4x32xbf16>, vector<4x32xbf16>, vector<4x32xbf16> -> vector<12x32xbf16>
    %c0_2 = arith.constant 0 : index
    %c0_3 = arith.constant 0 : index
    %6 = vector.load %arg2[%c0_2, %c0_3] : memref<8x12xbf16, #tpu.memory_space<vmem>>, vector<8x12xbf16>
    %cst = arith.constant dense<0.000000e+00> : vector<8x32xf32>
    %7 = tpu.matmul %6, %5, %cst {dimension_numbers = #tpu.dot_dimension_numbers<[1], [0], [0], [1], [0, 0, 1, 1], [], []>} : vector<8x12xbf16>, vector<12x32xbf16>, vector<8x32xf32> -> vector<8x32xf32>
    %cst_4 = arith.constant dense<0.000000e+00> : vector<8xf32>
    %8 = vector.multi_reduction <add>, %7, %cst_4 [1] : vector<8x32xf32> to vector<8xf32>
    %9 = vector.shape_cast %8 : vector<8xf32> to vector<8x1xf32>
    %10 = arith.mulf %7, %7 : vector<8x32xf32>
    %cst_5 = arith.constant dense<0.000000e+00> : vector<8xf32>
    %11 = vector.multi_reduction <add>, %10, %cst_5 [1] : vector<8x32xf32> to vector<8xf32>
    %12 = vector.shape_cast %11 : vector<8xf32> to vector<8x1xf32>
    %13 = tpu.concatenate %9, %12 in 1 : vector<8x1xf32>, vector<8x1xf32> -> vector<8x2xf32>
    %c0_6 = arith.constant 0 : index
    %c0_7 = arith.constant 0 : index
    %c0_8 = arith.constant 0 : index
    %14 = vector.load %arg3[%c0_6, %c0_7, %c0_8] : memref<1x8x2xf32, #tpu.memory_space<vmem>>, vector<1x8x2xf32>
    %15 = vector.shape_cast %14 : vector<1x8x2xf32> to vector<8x2xf32>
    %16 = vector.shape_cast %13 : vector<8x2xf32> to vector<1x8x2xf32>
    tpu.vector_store %arg3[%c0_6, %c0_7, %c0_8], %16 {strides = array<i32>} : memref<1x8x2xf32, #tpu.memory_space<vmem>>, vector<1x8x2xf32>,
    return
  }
  func.func @transform_0(%arg0: i32) -> (i32, i32, i32) {
    %c0_i32 = arith.constant 0 : i32
    %c0_i32_0 = arith.constant 0 : i32
    %c0_i32_1 = arith.constant 0 : i32
    return %arg0, %c0_i32, %c0_i32_0 : i32, i32, i32
  }
  func.func @transform_1(%arg0: i32) -> (i32, i32) {
    %c0_i32 = arith.constant 0 : i32
    %c0_i32_0 = arith.constant 0 : i32
    %c0_i32_1 = arith.constant 0 : i32
    return %c0_i32, %c0_i32_0 : i32, i32
  }
  func.func @transform_2(%arg0: i32) -> (i32, i32, i32) {
    %c0_i32 = arith.constant 0 : i32
    %c0_i32_0 = arith.constant 0 : i32
    %c0_i32_1 = arith.constant 0 : i32
    return %arg0, %c0_i32, %c0_i32_0 : i32, i32, i32
  }
}

module attributes {stable_mosaic.version = 11 : i64} {
  func.func @_apply_kernel(%arg0: i32, %arg1: memref<1x4x34xbf16, #tpu.memory_space<vmem>>, %arg2: memref<8x12xbf16, #tpu.memory_space<vmem>>, %arg3: memref<8x1xf32, #tpu.memory_space<vmem>>, %arg4: memref<8x1xf32, #tpu.memory_space<vmem>>, %arg5: memref<1x4x32xf32, #tpu.memory_space<vmem>>) attributes {dimension_semantics = [#tpu.dimension_semantics<parallel>], iteration_bounds = array<i64: 2>, scalar_prefetch = 0 : i64, scratch_operands = 0 : i64, tpu.core_type = #tpu.core_type<tc>, window_params = [{transform_indices = @transform_0, window_bounds = array<i64: 1, 4, 34>}, {pipeline_mode = #tpu.pipeline_mode<synchronous>, transform_indices = @transform_1, window_bounds = array<i64: 8, 12>}, {pipeline_mode = #tpu.pipeline_mode<synchronous>, transform_indices = @transform_2, window_bounds = array<i64: 8, 1>}, {pipeline_mode = #tpu.pipeline_mode<synchronous>, transform_indices = @transform_3, window_bounds = array<i64: 8, 1>}, {transform_indices = @transform_4, window_bounds = array<i64: 1, 4, 32>}]} {
    %c0 = arith.constant 0 : index
    %c0_0 = arith.constant 0 : index
    %c0_1 = arith.constant 0 : index
    %0 = vector.load %arg1[%c0, %c0_0, %c0_1] : memref<1x4x34xbf16, #tpu.memory_space<vmem>>, vector<1x4x34xbf16>
    %1 = vector.shape_cast %0 : vector<1x4x34xbf16> to vector<4x34xbf16>
    %2 = vector.extract_strided_slice %1 {offsets = [0, 0], sizes = [4, 32], strides = [1, 1]} : vector<4x34xbf16> to vector<4x32xbf16>
    %3 = vector.extract_strided_slice %1 {offsets = [0, 1], sizes = [4, 32], strides = [1, 1]} : vector<4x34xbf16> to vector<4x32xbf16>
    %4 = vector.extract_strided_slice %1 {offsets = [0, 2], sizes = [4, 32], strides = [1, 1]} : vector<4x34xbf16> to vector<4x32xbf16>
    %5 = tpu.concatenate %2, %3, %4 in 0 : vector<4x32xbf16>, vector<4x32xbf16>, vector<4x32xbf16> -> vector<12x32xbf16>
    %c0_2 = arith.constant 0 : index
    %c0_3 = arith.constant 0 : index
    %6 = vector.load %arg2[%c0_2, %c0_3] : memref<8x12xbf16, #tpu.memory_space<vmem>>, vector<8x12xbf16>
    %cst = arith.constant dense<0.000000e+00> : vector<8x32xf32>
    %7 = tpu.matmul %6, %5, %cst {dimension_numbers = #tpu.dot_dimension_numbers<[1], [0], [0], [1], [0, 0, 1, 1], [], []>} : vector<8x12xbf16>, vector<12x32xbf16>, vector<8x32xf32> -> vector<8x32xf32>
    %c0_4 = arith.constant 0 : index
    %c0_5 = arith.constant 0 : index
    %8 = vector.load %arg3[%c0_4, %c0_5] : memref<8x1xf32, #tpu.memory_space<vmem>>, vector<8x1xf32>
    %9 = vector.broadcast %8 : vector<8x1xf32> to vector<8x32xf32>
    %10 = arith.mulf %7, %9 : vector<8x32xf32>
    %c0_6 = arith.constant 0 : index
    %c0_7 = arith.constant 0 : index
    %11 = vector.load %arg4[%c0_6, %c0_7] : memref<8x1xf32, #tpu.memory_space<vmem>>, vector<8x1xf32>
    %12 = vector.broadcast %11 : vector<8x1xf32> to vector<8x32xf32>
    %13 = arith.addf %10, %12 : vector<8x32xf32>
    %14 = vector.extract_strided_slice %13 {offsets = [0, 0], sizes = [4, 32], strides = [1, 1]} : vector<8x32xf32> to vector<4x32xf32>
    %15 = vector.extract_strided_slice %13 {offsets = [4, 0], sizes = [4, 32], strides = [1, 1]} : vector<8x32xf32> to vector<4x32xf32>
    %16 = arith.negf %15 : vector<4x32xf32>
    %17 = math.exp %16 : vector<4x32xf32>
    %cst_8 = arith.constant 1.000000e+00 : f32
    %18 = vector.broadcast %cst_8 : f32 to vector<4x32xf32>
    %19 = arith.addf %18, %17 : vector<4x32xf32>
    %20 = arith.divf %18, %19 : vector<4x32xf32>
    %21 = arith.mulf %14, %20 : vector<4x32xf32>
    %c0_9 = arith.constant 0 : index
    %c0_10 = arith.constant 0 : index
    %c0_11 = arith.constant 0 : index
    %22 = vector.load %arg5[%c0_9, %c0_10, %c0_11] : memref<1x4x32xf32, #tpu.memory_space<vmem>>, vector<1x4x32xf32>
    %23 = vector.shape_cast %22 : vector<1x4x32xf32> to vector<4x32xf32>
    %24 = vector.shape_cast %21 : vector<4x32xf32> to vector<1x4x32xf32>
    tpu.vector_store %arg5[%c0_9, %c0_10, %c0_11], %24 {strides = array<i32>} : memref<1x4x32xf32, #tpu.memory_space<vmem>>, vector<1x4x32xf32>,
    return
  }
  func.func @transform_0(%arg0: i32) -> (i32, i32, i32) {
    %c0_i32 = arith.constant 0 : i32
    %c0_i32_0 = arith.constant 0 : i32
    %c0_i32_1 = arith.constant 0 : i32
    return %arg0, %c0_i32, %c0_i32_0 : i32, i32, i32
  }
  func.func @transform_1(%arg0: i32) -> (i32, i32) {
    %c0_i32 = arith.constant 0 : i32
    %c0_i32_0 = arith.constant 0 : i32
    %c0_i32_1 = arith.constant 0 : i32
    return %c0_i32, %c0_i32_0 : i32, i32
  }
  func.func @transform_2(%arg0: i32) -> (i32, i32) {
    %c0_i32 = arith.constant 0 : i32
    %c0_i32_0 = arith.constant 0 : i32
    %c0_i32_1 = arith.constant 0 : i32
    return %c0_i32, %c0_i32_0 : i32, i32
  }
  func.func @transform_3(%arg0: i32) -> (i32, i32) {
    %c0_i32 = arith.constant 0 : i32
    %c0_i32_0 = arith.constant 0 : i32
    %c0_i32_1 = arith.constant 0 : i32
    return %c0_i32, %c0_i32_0 : i32, i32
  }
  func.func @transform_4(%arg0: i32) -> (i32, i32, i32) {
    %c0_i32 = arith.constant 0 : i32
    %c0_i32_0 = arith.constant 0 : i32
    %c0_i32_1 = arith.constant 0 : i32
    return %arg0, %c0_i32, %c0_i32_0 : i32, i32, i32
  }
}

</mosaic_0001>

<bundles_post_ra>
// kernel: forward.2
= control target key start
LH: loop header
LB: loop body
LE: loop exit
PB: predicated region body
PF: predicated region fallthrough
CT: control target
= control target key end

     0   :  { %s291_s9 = smov 0   ;;  %s315_s0 = inlined_call_operand.vmem [shape: bf16[2,4,34], index: 0, kind: input, shape index: {}]   ;;  %s316_s1 = inlined_call_operand.vmem [shape: bf16[8,12], index: 1, kind: input, shape index: {}]   ;;  %s317_s2 = inlined_call_operand.vmem [shape: f32[2,8,2], index: 2, kind: output, shape index: {}]  }
   0x1 LB: > { %s246_s10 = sadd.s32 4294967295, %s272_s9   ;;  %p250_p0 = scmp.ge.s32.totalorder %s272_s9, 1  ;;  %s272_s9 = sphi %s291_s9, %s12_s9  }
   0x2   : > { %p111_p1 = scmp.lt.s32.totalorder %s272_s9, 3 }
   0x4   : > { %p112_p2 = pnand %p250_p0, %p111_p1 }
   0x5   : > { %p131_p3 = scmp.lt.s32.totalorder (!%p112_p2), %s246_s10, 1  ;;  %s274_s15 = smov (!%p112_p2), 127  }
   0x6   : > { %115 = sbr.rel (%p112_p2) target bundleno = 404 (0x194), region = 28  ;;  %s275_s16 = smov (!%p112_p2), 126  }
   0xb   : > { %s319_s10 = smov (!%p131_p3, %s246_s10), 1  ;;  %vm154_vm0 = vcmask 1041408   ;;  %vm157_vm1 = vcmask 1043456   ;;  %vm165_vm2 = vcmask 1045504   ;;  %v160_v8 = vld [vmem:[%s316_s1] sm:$0xf] }
   0xc   : > { %s251_s11 = sshll.u32 %s319_s10, 1  ;;  %vm161_vm3 = vcmask 97280   ;;  %vm181_vm4 = vcmask 261120   ;;  %s252_s19 = sshll.u32 %s319_s10, 3  ;;  %vm189_vm5 = vcmask 7168   ;;  %vm191_vm6 = vcmask 15360  }
   0xd   : > { %s134_s14 = scalar_lea.vmem %s315_s0, %s251_s11  ;;  %s138_s22 = scalar_lea.vmem %s317_s2, %s252_s19 }
   0xe   : > { %v140_v0 = vld [vmem:[%s134_s14] sm:$0x3] }
   0xf   : > { %143 = vst [vmem:[#allocation1 + $0x1] ss:$4 sm:$0xff] %v140_v0 }
  0x16   : > { %v144_v1 = vld.sshfl [vmem:[#allocation1] sm:$0xff pattern:$0x73625140] }
  0x17   : > { %146 = vrot.lane.b32.xlu0 %v144_v1, %s274_s15  ;;  %149 = vst [vmem:[#allocation1 + $0x2] ss:$4 sm:$0xff] %v140_v0 }
  0x1e   : > { %v150_v2 = vld.sshfl [vmem:[#allocation1] sm:$0xff pattern:$0x73625140] }
  0x1f   : > { %152 = vrot.lane.b32.xlu0 %v150_v2, %s275_s16 }
  0x89   : > { %v147_v3 = vpop.permute.xlu0 %146 }
  0x8a   : > { %v156_v4 = vsel %vm154_vm0, %v140_v0, %v147_v3 }
  0x91   : > { %v153_v5 = vpop.permute.xlu0 %152 }
  0x92   : > { %v159_v6 = vsel %vm157_vm1, %v156_v4, %v153_v5 }
  0x93   : > { %v166_v7 = vsel %vm165_vm2, %v159_v6, 0 }
  0x94   : > { %175 = vmatpush.bf16.msra.mxu0 %v166_v7 }
  0x97   : > { %253 = vmatmul.msk.bf16.vlgmr.msra.gmra.mxu0 %vm161_vm3, %v160_v8 }
 0x114   : > { %v177_v9 = vpop.f32.mrf.mxu0 }
 0x115   : > { %v182_v10 = vsel %vm181_vm4, %v177_v9, 0.0  ;;  %v185_v11 = vmul.f32 %v177_v9, %v177_v9 }
 0x116   : > { %183 = vadd.xlane.f32.xlu1 %v182_v10 }
 0x117   : > { %v186_v13 = vsel %vm181_vm4, %v185_v11, 0.0 }
 0x11c   : > { %v179_v12 = vpop.f32.mrf.mxu0 }
 0x11e   : > { %187 = vadd.xlane.f32.xlu1 %v186_v13 }
 0x189   : > { %v184_v14 = vpop.xlane.xlu1 %183 }
 0x191   : > { %v188_v15 = vpop.xlane.xlu1 %187 }
 0x192   : > { %v190_v16 = vsel %vm189_vm5, %v184_v14, %v188_v15 }
 0x193   : > { %192 = vst.msk [vmem:[%s138_s22] sm:$0xff] %vm191_vm6, %v190_v16 }
 0x194 PF: > { %s12_s9 = sadd.s32 1, %s272_s9  }
 0x195   : > { %p9_p4 = scmp.ge.s32.totalorder %s12_s9, 4  }
 0x197   :  { %11 = sbr.rel (!%p9_p4) target bundleno = 1 (0x1), region = 60 }

// kernel: forward.3
= control target key start
LH: loop header
LB: loop body
LE: loop exit
PB: predicated region body
PF: predicated region fallthrough
CT: control target
= control target key end

     0   :  { %9 = vsyncpa [#allocation3], 0  ;;  %s595_s0 = inlined_call_operand.vmem [shape: bf16[2,4,34], index: 0, kind: input, shape index: {}]   ;;  %s596_s1 = inlined_call_operand.vmem [shape: bf16[8,12], index: 1, kind: input, shape index: {}]   ;;  %s597_s2 = inlined_call_operand.vmem [shape: f32[8,1], index: 2, kind: input, shape index: {}]   ;;  %s598_s3 = inlined_call_operand.vmem [shape: f32[8,1], index: 3, kind: input, shape index: {}]   ;;  %s599_s4 = inlined_call_operand.hbm [shape: f32[2,4,32], index: 4, kind: output, shape index: {}]  }
   0x1   :  { %11 = vsyncpa [#allocation3 + $0x1], 0  ;;  %s501_s15 = smov 0   ;;  %s503_s16 = smov 0  }
   0x2   :  { %s505_s17 = smov 0   ;;  %s507_s18 = smov 0  }
   0x3 LB: > { %s522_s19 = sadd.s32 4294967295, %s471_s18   ;;  %s349_s20 = sadd.s32 4294967294, %s471_s18   ;;  %s471_s18 = sphi %s507_s18, %s605_s18   ;;  %s467_s17 = sphi %s505_s17, %s604_s17   ;;  %s463_s16 = sphi %s503_s16, %s603_s16   ;;  %s459_s15 = sphi %s501_s15, %s602_s15  }
   0x4   : > { %s526_s21 = sadd.s32 1, %s471_s18   ;;  %s113_s22 = sadd.s32 1, %s467_s17 }
   0x5   : > { %s110_s23 = ssub.s32 %s471_s18, %s526_s21  ;;  %p123_p0 = scmp.ne.s32.totalorder %s467_s17, %s463_s16 }
   0x6   : > { %p111_p1 = scmp.eq.s32.totalorder %s110_s23, 0  ;;  %p124_p2 = scmp.eq.s32.totalorder %s522_s19, 1 }
   0x7   : > { %p129_p3 = scmp.ne.s32.totalorder %s463_s16, %s459_s15  ;;  %p130_p4 = scmp.eq.s32.totalorder %s349_s20, 1 }
   0x8   : > { %s537_s24 = scalar_select %p111_p1, %s467_s17, %s113_s22  }
   0x9   : > { %p539_p5 = por %p124_p2, %p123_p0  ;;  %p543_p6 = por %p130_p4, %p129_p3 }
   0xa   : > { %p352_p7 = scmp.ge.s32.totalorder %s471_s18, 1  ;;  %p164_p8 = scmp.lt.s32.totalorder %s471_s18, 3 }
   0xc   : > { %p165_p9 = pnand %p352_p7, %p164_p8 }
   0xd   : > { %p189_p10 = scmp.lt.s32.totalorder (!%p165_p9), %s522_s19, 1  ;;  %s473_s6 = smov (!%p165_p9), 127  }
   0xe   : > { %168 = sbr.rel (%p165_p9) target bundleno = 325 (0x145), region = 36  ;;  %s474_s7 = smov (!%p165_p9), 126  }
   0xf   : > { %s186_s14 = sand.u32 (!%p165_p9), 1, %s463_s16   ;;  %s358_s22 = sshll.u32 (!%p165_p9), %s522_s19, 2 }
  0x10   : > { %s353_s20 = sshll.u32 (!%p165_p9), %s186_s14, 2  ;;  %s429_s10 = scalar_lea.hbm (!%p165_p9), %s599_s4, 8 }
  0x11   : > { %s188_s29 = scalar_lea.vmem (!%p165_p9), [#allocation2], %s353_s20 }
  0x12   : > { %s287_s30 = sshll.u32 (!%p165_p9), %s188_s29, 4  ;;  %s288_s30 = int_to_ptr.vmem [resolvable:$true] %s287_s30 }
  0x13   : > { %s190_s27 = scalar_select %p189_p10, %s522_s19, 1  ;;  %v235_v3 = vld [vmem:[%s597_s2] sm:$0xff]  ;;  %v475_v4 = vmov 0   ;;  %vm208_vm0 = vcmask 1041408   ;;  %vm211_vm1 = vcmask 1043456   ;;  %vm219_vm2 = vcmask 1045504  }
  0x14   : > { %403 = vset.pattern.permute.xlu1 %v475_v4  ;;  %404 = vset.pattern.permute.xlu0 %v475_v4  ;;  %v242_v5 = vld [vmem:[%s598_s3] sm:$0xff]  ;;  %vm215_vm3 = vcmask 97280   ;;  %vm272_vm8 = vcmask 257024   ;;  %s275_s19 = scalar_lea.sflag [#allocation3], %s186_s14 }
  0x15   : > { %s354_s28 = sshll.u32 %s190_s27, 1  ;;  %238 = vperm.xlu1 %403, %v235_v3   ;;  %v214_v11 = vld [vmem:[%s596_s1] sm:$0xf] }
  0x16   : > { %s192_s5 = scalar_lea.vmem %s595_s0, %s354_s28  ;;  %s285_s28 = scalar_lea.hbm %s599_s4, %s358_s22 }
  0x17   : > { %v194_v0 = vld [vmem:[%s192_s5] sm:$0x3]  ;;  %s289_s5 = sshll.u32 %s285_s28, 4  ;;  %s290_s5 = int_to_ptr.hbm [resolvable:$true] %s289_s5 }
  0x18   : > { %197 = vst [vmem:[#allocation1 + $0x1] ss:$4 sm:$0xff] %v194_v0 }
  0x1d   : > { %245 = vperm.xlu1 %403, %v242_v5  }
  0x1f   : > { %v198_v1 = vld.sshfl [vmem:[#allocation1] sm:$0xff pattern:$0x73625140] }
  0x20   : > { %200 = vrot.lane.b32.xlu0 %v198_v1, %s473_s6  ;;  %203 = vst [vmem:[#allocation1 + $0x2] ss:$4 sm:$0xff] %v194_v0  ;;  %s423_s6 = sshra.s32 %s290_s5, 4  ;;  %s424_s6 = int_to_ptr.hbm [resolvable:$true] %s423_s6 }
  0x21   : > { %p430_p0 = scmp.lt.s32.totalorder %s424_s6, %s599_s4 }
  0x27   : > { %v204_v2 = vld.sshfl [vmem:[#allocation1] sm:$0xff pattern:$0x73625140] }
  0x28   : > { %206 = vrot.lane.b32.xlu0 %v204_v2, %s474_s7  ;;  %s425_s7 = scalar_lea.hbm %s424_s6, 4 }
  0x29   : > { %p426_p11 = scmp.ne.s32.totalorder %s424_s6, %s425_s7  ;;  %p431_p1 = scmp.lt.s32.totalorder %s429_s10, %s425_s7 }
  0x2b   : > { %p427_p12 = pnand %p426_p11, %p539_p5  ;;  %p432_p2 = por %p431_p1, %p430_p0 }
  0x2d   : > { %p428_p13 = pneg %p427_p12 }
  0x2f   : > { %p433_p3 = pnand %p432_p2, %p428_p13 }
  0x87   : > { %v239_v12 = vpop.permute.xlu1 %238 }
  0x8f   : > { %v246_v15 = vpop.permute.xlu1 %245 }
  0x92   : > { %v201_v6 = vpop.permute.xlu0 %200 }
  0x93   : > { %v210_v7 = vsel %vm208_vm0, %v194_v0, %v201_v6 }
  0x9a   : > { %v207_v8 = vpop.permute.xlu0 %206 }
  0x9b   : > { %v213_v9 = vsel %vm211_vm1, %v210_v7, %v207_v8 }
  0x9c   : > { %v220_v10 = vsel %vm219_vm2, %v213_v9, 0 }
  0x9d   : > { %229 = vmatpush.bf16.msra.mxu0 %v220_v10 }
  0xa0   : > { %355 = vmatmul.msk.bf16.vlgmr.msra.gmra.mxu0 %vm215_vm3, %v214_v11 }
 0x11d   : > { %v231_v13 = vpop.f32.mrf.mxu0 }
 0x11e   : > { %v241_v14 = vmul.f32 %v239_v12, %v231_v13 }
 0x120   : > { %v248_v16 = vadd.f32 %v246_v15, %v241_v14 }
 0x122   : > { %v356_v17 = vmul.f32 -1.442695, %v248_v16 }
 0x124   : > { %405 = vpow2.f32 %v356_v17 }
 0x125   : > { %v233_v18 = vpop.f32.mrf.mxu0 }
 0x12a   : > { %v406_v19 = vpop.eup %405 }
 0x12b   : > { %v252_v20 = vadd.f32 1.0, %v406_v19 }
 0x12d   : > { %407 = vrcp.f32 %v252_v20  ;;  %v264_v24 = vand.u32 2147483648, %v252_v20  ;;  %v262_v26 = vand.u32 2147483647, %v252_v20  ;;  %vm258_vm5 = vweird.f32 %v252_v20 }
 0x12f   : > { %v265_v28 = vor.u32 1.1754944e-38, %v264_v24  ;;  %vm263_vm7 = vcmp.eq.f32.partialorder %v262_v26, 8.507059e+37 }
 0x133   : > { %v408_v21 = vpop.eup %407 }
 0x134   : > { %v254_v22 = vmul.f32 %v408_v21, %v252_v20  ;;  %vm259_vm4 = vweird.f32 %v408_v21 }
 0x135   : > { %vm260_vm6 = vmor %vm258_vm5, %vm259_vm4 }
 0x136   : > { %v255_v23 = vsub.f32 1.0, %v254_v22 }
 0x138   : > { %v256_v25 = vmul.f32 %v408_v21, %v255_v23 }
 0x13a   : > { %v257_v27 = vadd.f32 %v408_v21, %v256_v25 }
 0x13c   : > { %v261_v29 = vsel %vm260_vm6, %v408_v21, %v257_v27 }
 0x13d   : > { %v266_v30 = vsel %vm263_vm7, %v265_v28, %v261_v29 }
 0x13e   : > { %v269_v31 = vrot.slane %v266_v30, 4 }
 0x140   : > { %v271_v32 = vmul.f32 %v269_v31, %v248_v16 }
 0x142   : > { %273 = vst.msk [vmem:[%s188_s29] sm:$0xf] %vm272_vm8, %v271_v32 }
 0x143   : > { %436 = shalt.err (!%p433_p3)
}
 0x144   : > { %361 = dma.vmem_to_hbm [thread:$0]  (%p539_p5), %s288_s30, 64, %s290_s5, %s275_s19  }
 0x145 PF: > { %p367_p4 = scmp.ge.s32.totalorder %s471_s18, 2  ;;  %s301_s13 = sand.u32 1, %s459_s15  }
 0x146   : > { %s302_s14 = scalar_lea.sflag [#allocation3], %s301_s13 }
 0x147   : > { %p364_p7 = pnand %p367_p4, %p543_p6 }
 0x149   : > { %p365_p8 = pneg %p364_p7 }
 0x14b   : > { %454 = dma.done.wait (%p365_p8), %s302_s14, 64  }
 0x14c   : > { %456 = vsyncadd (%p365_p8), %s302_s14, 4294967232  ;;  %p14_p9 = scmp.ge.s32.totalorder %s526_s21, 4   ;;  %s602_s15 = smov %s463_s16 }
 0x14d   : > { %s603_s16 = smov %s467_s17  ;;  %s604_s17 = smov %s537_s24 }
 0x14e   : > { %s605_s18 = smov %s526_s21  ;;  %16 = sbr.rel (!%p14_p9) target bundleno = 3 (0x3), region = 73 }
 0x153   :  { %308 = vsyncpa [#allocation3], 1 }
 0x154   :  { %310 = vsyncpa [#allocation3 + $0x1], 1 }

</bundles_post_ra>
